<compile_context>
chip_gen: v7x
topology: tpu7x:2x2x1
jax: 0.10.0
libtpu: 0.0.40
codegen_flags: <defaults>
</compile_context>

<pallas_src>
import jax
import jax.numpy as jnp
from jax.experimental import pallas as pl
from jax.experimental.pallas import tpu as pltpu


def mlp_kernel(x_ref,
               w1_ref, b1_ref,
               w2_ref, b2_ref,
               w3_ref, b3_ref,
               w4d_ref, b4d_ref,
               o_ref):
    # bf16 activations into the MXU, f32 accumulation out of it.
    x = x_ref[...].astype(jnp.bfloat16)                            # (TB, 104)

    # fc1 + ReLU   (104 -> 256)
    h1 = jnp.dot(x, w1_ref[...], preferred_element_type=jnp.float32) + b1_ref[...]
    h1 = jnp.maximum(h1, 0.0).astype(jnp.bfloat16)
    # TODO(synk): dropout is identity at inference; training-mode dropout would need pltpu.prng_* masks.

    # fc2 + ReLU   (256 -> 128)
    h2 = jnp.dot(h1, w2_ref[...], preferred_element_type=jnp.float32) + b2_ref[...]
    h2 = jnp.maximum(h2, 0.0).astype(jnp.bfloat16)

    # fc3 + ReLU   (128 -> 32)
    h3 = jnp.dot(h2, w3_ref[...], preferred_element_type=jnp.float32) + b3_ref[...]
    h3 = jnp.maximum(h3, 0.0)                                       # (TB, 32) f32

    # fc4 + softmax(dim=1) over 2 classes == sigmoid(logit1 - logit0).
    # w4d = (w4[:,1]-w4[:,0]) as a (1, 32) row, b4d = b4[:,1]-b4[:,0] as (1, 1).
    # Done on VPU (mul) + XLU (32-lane reduce) instead of an N=1 MXU matmul.
    z = jnp.sum(h3 * w4d_ref[...], axis=-1, keepdims=True) + b4d_ref[...]   # (TB, 1)
    p1 = pl.reciprocal(1.0 + jnp.exp(-z), approx=True)              # EUP exp + vrcp
    o_ref[...] = p1                                                 # p1 column only (lane-denser DMA)


def _round_up(n, m):
    return ((n + m - 1) // m) * m


def _vmem_capacity_bytes():
    try:
        return int(pltpu.get_tpu_info().vmem_capacity_bytes)
    except Exception:
        return 64 << 20   # conservative (v7x-sized) fallback


def neural_network_forward(x, params, *, tb=8192):
    """x: (B, 104) float32 or bfloat16. params: (in,out) weights, (1,out) biases (f32).

    Returns (B, 2) float32 softmax probabilities.
    """
    B, F = x.shape

    # ---- Hardware-aware batch-tile cap -------------------------------------------------
    vmem = _vmem_capacity_bytes()
    if vmem >= (100 << 20):          # v5e / v6e: 128 MiB physical VMEM
        hw_cap, vmem_limit = 8192, 64 << 20
    else:                            # v7x: 64 MiB per TensorCore -> stay in default scoped VMEM
        hw_cap, vmem_limit = 4096, None
    tb_cap = max(8, min(tb, hw_cap))

    # Tile (multiple of 8). Pick TB so the grid has >=2 steps when the batch allows,
    # so "parallel" can shard across both v7x TensorCores.
    B8 = _round_up(B, 8)
    TB = max(8, min(tb_cap, _round_up(pl.cdiv(B8, 2), 8)))
    Bp = _round_up(B, TB)
    steps = Bp // TB
    if Bp != B:
        x = jnp.pad(x, ((0, Bp - B), (0, 0)))

    # ---- One-time wrapper-side weight prep ---------------------------------------------
    # bf16 weights for the MXU, f32 biases; fc4 + 2-class softmax collapsed to a single
    # logit-difference row for a VPU/XLU 32->1 projection.
    w1 = params["w1"].astype(jnp.bfloat16)
    w2 = params["w2"].astype(jnp.bfloat16)
    w3 = params["w3"].astype(jnp.bfloat16)
    b1, b2, b3 = params["b1"], params["b2"], params["b3"]
    w4, b4 = params["w4"], params["b4"]
    w4d = (w4[:, 1] - w4[:, 0]).reshape(1, -1).astype(jnp.float32)   # (1, 32)
    b4d = (b4[:, 1:2] - b4[:, 0:1]).astype(jnp.float32)              # (1, 1)

    # ---- Cost estimate (advisory) -------------------------------------------------------
    mac = 104 * 256 + 256 * 128 + 128 * 32 + 32
    w_bytes = (w1.size + w2.size + w3.size) * 2 + w4d.size * 4 \
        + (b1.size + b2.size + b3.size + b4d.size) * 4
    cost = pl.CostEstimate(
        flops=2 * mac * Bp,
        transcendentals=2 * Bp,                                   # exp + approx reciprocal per row
        bytes_accessed=Bp * (F * x.dtype.itemsize + 4) + int(w_bytes))

    # Weights/biases: full-array blocks, resident in VMEM across all grid steps.
    def resident(a):
        return pl.BlockSpec(a.shape, lambda i: (0, 0))

    def run(x_buffers):
        x_kwargs = {}
        if x_buffers > 2:
            x_kwargs["pipeline_mode"] = pl.Buffered(x_buffers)
        x_spec = pl.BlockSpec((TB, F), lambda i: (i, 0), **x_kwargs)
        return pl.pallas_call(
            mlp_kernel,
            out_shape=jax.ShapeDtypeStruct((Bp, 1), jnp.float32),
            grid=(steps,),
            in_specs=[
                x_spec,                                           # x: tiled over batch
                resident(w1), resident(b1),
                resident(w2), resident(b2),
                resident(w3), resident(b3),
                resident(w4d), resident(b4d),
            ],
            out_specs=pl.BlockSpec((TB, 1), lambda i: (i, 0)),
            compiler_params=pltpu.CompilerParams(
                dimension_semantics=("parallel",),                # v7x: shard batch over 2 TCs
                vmem_limit_bytes=vmem_limit),
            cost_estimate=cost,
        )(x, w1, b1, w2, b2, w3, b3, w4d, b4d)

    want_buffers = 3 if steps >= 3 else 2
    try:
        out = run(want_buffers)
    except Exception:
        if want_buffers == 2:
            raise
        out = run(2)                                              # fallback: default double-buffering

    p1 = out[:B]                                                  # (B, 1)
    # Rows of [p0, p1] sum to exactly 1 by construction.
    return jnp.concatenate([1.0 - p1, p1], axis=-1)


def neural_network_ref(x, params):
    """Pure-JAX f32 reference (matches the PyTorch module in eval mode)."""
    h = x
    for i in range(1, 4):
        h = jnp.maximum(h @ params[f"w{i}"] + params[f"b{i}"], 0.0)
    logits = h @ params["w4"] + params["b4"]
    return jax.nn.softmax(logits, axis=-1)


def init_params(key):
    """Deterministic init mimicking nn.Linear's U(-1/sqrt(in), 1/sqrt(in))."""
    dims = [(104, 256), (256, 128), (128, 32), (32, 2)]
    params = {}
    keys = jax.random.split(key, 2 * len(dims))
    for i, (fan_in, fan_out) in enumerate(dims):
        bound = 1.0 / (fan_in ** 0.5)
        w = jax.random.uniform(keys[2 * i], (fan_in, fan_out),
                               minval=-bound, maxval=bound, dtype=jnp.float32)
        b = jax.random.uniform(keys[2 * i + 1], (1, fan_out),
                               minval=-bound, maxval=bound, dtype=jnp.float32)
        params[f"w{i + 1}"] = w
        params[f"b{i + 1}"] = b
    return params


if __name__ == "__main__":
    key = jax.random.PRNGKey(0)
    k_x, k_x2, k_p = jax.random.split(key, 3)
    params = init_params(k_p)

    # Small demo batch (single grid step path).
    B = 8
    x = jax.random.normal(k_x, (B, 104), dtype=jnp.float32)
    out = jax.block_until_ready(neural_network_forward(x, params))
    assert out.shape == (B, 2)
    assert bool(jnp.all(jnp.abs(jnp.sum(out, axis=-1) - 1.0) < 1e-5))     # softmax rows sum to 1
    ref = neural_network_ref(x, params)
    assert bool(jnp.all(jnp.abs(out - ref) < 5e-2))                        # bf16 matmuls + approx recip

    # Larger, non-aligned batch: exercises padding, the multi-step "parallel" grid and
    # (where the step count allows) the 3-deep x pipeline.
    B2 = 20011
    x2 = jax.random.normal(k_x2, (B2, 104), dtype=jnp.float32)
    out2 = jax.block_until_ready(neural_network_forward(x2, params))
    ref2 = neural_network_ref(x2, params)
    assert out2.shape == (B2, 2)
    assert bool(jnp.all(jnp.abs(jnp.sum(out2, axis=-1) - 1.0) < 1e-5))
    assert bool(jnp.all(jnp.abs(out2 - ref2) < 5e-2))

    print("KERNEL_OK")
</pallas_src>

<mosaic_0001>
module attributes {stable_mosaic.version = 11 : i64} {
  func.func @mlp_kernel(%arg0: i32, %arg1: memref<8x104xf32, #tpu.memory_space<vmem>>, %arg2: memref<104x256xbf16, #tpu.memory_space<vmem>>, %arg3: memref<1x256xf32, #tpu.memory_space<vmem>>, %arg4: memref<256x128xbf16, #tpu.memory_space<vmem>>, %arg5: memref<1x128xf32, #tpu.memory_space<vmem>>, %arg6: memref<128x32xbf16, #tpu.memory_space<vmem>>, %arg7: memref<1x32xf32, #tpu.memory_space<vmem>>, %arg8: memref<1x32xf32, #tpu.memory_space<vmem>>, %arg9: memref<1x1xf32, #tpu.memory_space<vmem>>, %arg10: memref<8x1xf32, #tpu.memory_space<vmem>>) attributes {dimension_semantics = [#tpu.dimension_semantics<parallel>], iteration_bounds = array<i64: 1>, scalar_prefetch = 0 : i64, scratch_operands = 0 : i64, tpu.core_type = #tpu.core_type<tc>, window_params = [{transform_indices = @transform_0, window_bounds = array<i64: 8, 104>}, {pipeline_mode = #tpu.pipeline_mode<synchronous>, transform_indices = @transform_1, window_bounds = array<i64: 104, 256>}, {pipeline_mode = #tpu.pipeline_mode<synchronous>, transform_indices = @transform_2, window_bounds = array<i64: 1, 256>}, {pipeline_mode = #tpu.pipeline_mode<synchronous>, transform_indices = @transform_3, window_bounds = array<i64: 256, 128>}, {pipeline_mode = #tpu.pipeline_mode<synchronous>, transform_indices = @transform_4, window_bounds = array<i64: 1, 128>}, {pipeline_mode = #tpu.pipeline_mode<synchronous>, transform_indices = @transform_5, window_bounds = array<i64: 128, 32>}, {pipeline_mode = #tpu.pipeline_mode<synchronous>, transform_indices = @transform_6, window_bounds = array<i64: 1, 32>}, {pipeline_mode = #tpu.pipeline_mode<synchronous>, transform_indices = @transform_7, window_bounds = array<i64: 1, 32>}, {pipeline_mode = #tpu.pipeline_mode<synchronous>, transform_indices = @transform_8, window_bounds = array<i64: 1, 1>}, {transform_indices = @transform_9, window_bounds = array<i64: 8, 1>}]} {
    %c0 = arith.constant 0 : index
    %c0_0 = arith.constant 0 : index
    %0 = vector.load %arg1[%c0, %c0_0] : memref<8x104xf32, #tpu.memory_space<vmem>>, vector<8x104xf32>
    %1 = arith.truncf %0 : vector<8x104xf32> to vector<8x104xbf16>
    %c0_1 = arith.constant 0 : index
    %c0_2 = arith.constant 0 : index
    %2 = vector.load %arg2[%c0_1, %c0_2] : memref<104x256xbf16, #tpu.memory_space<vmem>>, vector<104x256xbf16>
    %cst = arith.constant dense<0.000000e+00> : vector<8x256xf32>
    %3 = tpu.matmul %1, %2, %cst {dimension_numbers = #tpu.dot_dimension_numbers<[1], [0], [0], [1], [0, 0, 1, 1], [], []>} : vector<8x104xbf16>, vector<104x256xbf16>, vector<8x256xf32> -> vector<8x256xf32>
    %c0_3 = arith.constant 0 : index
    %c0_4 = arith.constant 0 : index
    %4 = vector.load %arg3[%c0_3, %c0_4] : memref<1x256xf32, #tpu.memory_space<vmem>>, vector<1x256xf32>
    %5 = vector.broadcast %4 : vector<1x256xf32> to vector<8x256xf32>
    %6 = arith.addf %3, %5 : vector<8x256xf32>
    %cst_5 = arith.constant 0.000000e+00 : f32
    %7 = vector.broadcast %cst_5 : f32 to vector<8x256xf32>
    %8 = arith.maximumf %6, %7 : vector<8x256xf32>
    %9 = arith.truncf %8 : vector<8x256xf32> to vector<8x256xbf16>
    %c0_6 = arith.constant 0 : index
    %c0_7 = arith.constant 0 : index
    %10 = vector.load %arg4[%c0_6, %c0_7] : memref<256x128xbf16, #tpu.memory_space<vmem>>, vector<256x128xbf16>
    %cst_8 = arith.constant dense<0.000000e+00> : vector<8x128xf32>
    %11 = tpu.matmul %9, %10, %cst_8 {dimension_numbers = #tpu.dot_dimension_numbers<[1], [0], [0], [1], [0, 0, 1, 1], [], []>} : vector<8x256xbf16>, vector<256x128xbf16>, vector<8x128xf32> -> vector<8x128xf32>
    %c0_9 = arith.constant 0 : index
    %c0_10 = arith.constant 0 : index
    %12 = vector.load %arg5[%c0_9, %c0_10] : memref<1x128xf32, #tpu.memory_space<vmem>>, vector<1x128xf32>
    %13 = vector.broadcast %12 : vector<1x128xf32> to vector<8x128xf32>
    %14 = arith.addf %11, %13 : vector<8x128xf32>
    %cst_11 = arith.constant 0.000000e+00 : f32
    %15 = vector.broadcast %cst_11 : f32 to vector<8x128xf32>
    %16 = arith.maximumf %14, %15 : vector<8x128xf32>
    %17 = arith.truncf %16 : vector<8x128xf32> to vector<8x128xbf16>
    %c0_12 = arith.constant 0 : index
    %c0_13 = arith.constant 0 : index
    %18 = vector.load %arg6[%c0_12, %c0_13] : memref<128x32xbf16, #tpu.memory_space<vmem>>, vector<128x32xbf16>
    %cst_14 = arith.constant dense<0.000000e+00> : vector<8x32xf32>
    %19 = tpu.matmul %17, %18, %cst_14 {dimension_numbers = #tpu.dot_dimension_numbers<[1], [0], [0], [1], [0, 0, 1, 1], [], []>} : vector<8x128xbf16>, vector<128x32xbf16>, vector<8x32xf32> -> vector<8x32xf32>
    %c0_15 = arith.constant 0 : index
    %c0_16 = arith.constant 0 : index
    %20 = vector.load %arg7[%c0_15, %c0_16] : memref<1x32xf32, #tpu.memory_space<vmem>>, vector<1x32xf32>
    %21 = vector.broadcast %20 : vector<1x32xf32> to vector<8x32xf32>
    %22 = arith.addf %19, %21 : vector<8x32xf32>
    %cst_17 = arith.constant 0.000000e+00 : f32
    %23 = vector.broadcast %cst_17 : f32 to vector<8x32xf32>
    %24 = arith.maximumf %22, %23 : vector<8x32xf32>
    %c0_18 = arith.constant 0 : index
    %c0_19 = arith.constant 0 : index
    %25 = vector.load %arg8[%c0_18, %c0_19] : memref<1x32xf32, #tpu.memory_space<vmem>>, vector<1x32xf32>
    %26 = vector.broadcast %25 : vector<1x32xf32> to vector<8x32xf32>
    %27 = arith.mulf %24, %26 : vector<8x32xf32>
    %cst_20 = arith.constant dense<0.000000e+00> : vector<8xf32>
    %28 = vector.multi_reduction <add>, %27, %cst_20 [1] : vector<8x32xf32> to vector<8xf32>
    %29 = vector.shape_cast %28 : vector<8xf32> to vector<8x1xf32>
    %c0_21 = arith.constant 0 : index
    %c0_22 = arith.constant 0 : index
    %30 = vector.load %arg9[%c0_21, %c0_22] : memref<1x1xf32, #tpu.memory_space<vmem>>, vector<1x1xf32>
    %31 = vector.broadcast %30 : vector<1x1xf32> to vector<8x1xf32>
    %32 = arith.addf %29, %31 : vector<8x1xf32>
    %cst_23 = arith.constant 0.000000e+00 : f32
    %33 = vector.broadcast %cst_23 : f32 to vector<8x1xf32>
    %34 = arith.subf %33, %32 : vector<8x1xf32>
    %35 = math.exp %34 : vector<8x1xf32>
    %cst_24 = arith.constant 1.000000e+00 : f32
    %36 = vector.broadcast %cst_24 : f32 to vector<8x1xf32>
    %37 = arith.addf %36, %35 : vector<8x1xf32>
    %38 = tpu.reciprocal %37 {approx = true} : vector<8x1xf32> -> vector<8x1xf32>
    %c0_25 = arith.constant 0 : index
    %c0_26 = arith.constant 0 : index
    %39 = vector.load %arg10[%c0_25, %c0_26] : memref<8x1xf32, #tpu.memory_space<vmem>>, vector<8x1xf32>
    tpu.vector_store %arg10[%c0_25, %c0_26], %38 {strides = array<i32>} : memref<8x1xf32, #tpu.memory_space<vmem>>, vector<8x1xf32>,
    return
  }
  func.func @transform_0(%arg0: i32) -> (i32, i32) {
    %c0_i32 = arith.constant 0 : i32
    %c0_i32_0 = arith.constant 0 : i32
    return %arg0, %c0_i32 : i32, i32
  }
  func.func @transform_1(%arg0: i32) -> (i32, i32) {
    %c0_i32 = arith.constant 0 : i32
    %c0_i32_0 = arith.constant 0 : i32
    %c0_i32_1 = arith.constant 0 : i32
    return %c0_i32, %c0_i32_0 : i32, i32
  }
  func.func @transform_2(%arg0: i32) -> (i32, i32) {
    %c0_i32 = arith.constant 0 : i32
    %c0_i32_0 = arith.constant 0 : i32
    %c0_i32_1 = arith.constant 0 : i32
    return %c0_i32, %c0_i32_0 : i32, i32
  }
  func.func @transform_3(%arg0: i32) -> (i32, i32) {
    %c0_i32 = arith.constant 0 : i32
    %c0_i32_0 = arith.constant 0 : i32
    %c0_i32_1 = arith.constant 0 : i32
    return %c0_i32, %c0_i32_0 : i32, i32
  }
  func.func @transform_4(%arg0: i32) -> (i32, i32) {
    %c0_i32 = arith.constant 0 : i32
    %c0_i32_0 = arith.constant 0 : i32
    %c0_i32_1 = arith.constant 0 : i32
    return %c0_i32, %c0_i32_0 : i32, i32
  }
  func.func @transform_5(%arg0: i32) -> (i32, i32) {
    %c0_i32 = arith.constant 0 : i32
    %c0_i32_0 = arith.constant 0 : i32
    %c0_i32_1 = arith.constant 0 : i32
    return %c0_i32, %c0_i32_0 : i32, i32
  }
  func.func @transform_6(%arg0: i32) -> (i32, i32) {
    %c0_i32 = arith.constant 0 : i32
    %c0_i32_0 = arith.constant 0 : i32
    %c0_i32_1 = arith.constant 0 : i32
    return %c0_i32, %c0_i32_0 : i32, i32
  }
  func.func @transform_7(%arg0: i32) -> (i32, i32) {
    %c0_i32 = arith.constant 0 : i32
    %c0_i32_0 = arith.constant 0 : i32
    %c0_i32_1 = arith.constant 0 : i32
    return %c0_i32, %c0_i32_0 : i32, i32
  }
  func.func @transform_8(%arg0: i32) -> (i32, i32) {
    %c0_i32 = arith.constant 0 : i32
    %c0_i32_0 = arith.constant 0 : i32
    %c0_i32_1 = arith.constant 0 : i32
    return %c0_i32, %c0_i32_0 : i32, i32
  }
  func.func @transform_9(%arg0: i32) -> (i32, i32) {
    %c0_i32 = arith.constant 0 : i32
    %c0_i32_0 = arith.constant 0 : i32
    return %arg0, %c0_i32 : i32, i32
  }
}

</mosaic_0001>

<bundles_post_ra>
// kernel: tpu_custom_call.1
= control target key start
LH: loop header
LB: loop body
LE: loop exit
PB: predicated region body
PF: predicated region fallthrough
CT: control target
= control target key end

     0   :  { %s864_s0 = inlined_call_operand.vmem [shape: f32[8,104], index: 0, kind: input, shape index: {}]   ;;  %s865_s1 = inlined_call_operand.hbm [shape: bf16[104,256], index: 1, kind: input, shape index: {}]   ;;  %s866_s2 = inlined_call_operand.vmem [shape: f32[1,256], index: 2, kind: input, shape index: {}]   ;;  %s867_s3 = inlined_call_operand.hbm [shape: bf16[256,128], index: 3, kind: input, shape index: {}]   ;;  %s868_s4 = inlined_call_operand.vmem [shape: f32[1,128], index: 4, kind: input, shape index: {}]   ;;  %s869_s5 = inlined_call_operand.vmem [shape: bf16[128,32], index: 5, kind: input, shape index: {}]   ;;  %s870_s6 = inlined_call_operand.vmem [shape: f32[1,32], index: 6, kind: input, shape index: {}]   ;;  %s871_s7 = inlined_call_operand.vmem [shape: f32[1,32], index: 7, kind: input, shape index: {}]   ;;  %s872_s8 = inlined_call_operand.<no memory space> [shape: f32[1,1], index: 8, kind: input, shape index: {}]   ;;  %s873_s9 = inlined_call_operand.vmem [shape: f32[8,1], index: 9, kind: output, shape index: {}]  }
   0x1   :  { %v14_v0 = vstv %s872_s8 }
   0x2   :  { %15 = vst [vmem:[#allocation2] sm:$0x1] %v14_v0 }
   0x3   :  { %16 = vsyncpa [#allocation4], 0 }
   0x4   :  { %17 = vsyncpa [#allocation6], 0  ;;  %s733_s11 = smov [#allocation3]   ;;  %s685_s15 = scalar_lea.hbm %s865_s1, 1664 }
   0x5   :  { %s25_s12 = sshll.u32 %s733_s11, 4  ;;  %p686_p0 = scmp.ne.s32.totalorder %s865_s1, %s685_s15  ;;  %s26_s12 = int_to_ptr.vmem [resolvable:$true] %s25_s12 }
   0x6   :  { %p689_p1 = scmp.lt.u32.totalorder %s685_s15, %s865_s1 }
   0x8   :  { %p691_p2 = pnand %p689_p1, %p686_p0 }
   0xa   :  { %694 = shalt.err (!%p691_p2)
}
   0xb   :  { %s695_s8 = scalar_lea.vmem %s26_s12, 1664  ;;  %p700_p4 = scmp.lt.s32.totalorder %s26_s12, %s26_s12 }
   0xc   :  { %p696_p3 = scmp.ne.s32.totalorder %s26_s12, %s695_s8  ;;  %p701_p5 = scmp.lt.s32.totalorder %s695_s8, %s695_s8 }
   0xe   :  { %p702_p6 = por %p701_p5, %p700_p4 }
  0x10   :  { %p703_p7 = pnand %p702_p6, %p696_p3 }
  0x12   :  { %706 = shalt.err (!%p703_p7)
}
  0x13   :  { %s734_s20 = smov 128   ;;  %s735_s21 = smov 8  }
  0x14   :  { %31 = dma.hbm_to_vmem [thread:$0]  %s865_s1, 1664, %s26_s12, [#allocation4], %s734_s20, %s734_s20, %s735_s21  }
  0x15   :  { %s736_s24 = smov [#allocation5]   ;;  %s707_s28 = scalar_lea.hbm %s867_s3, 2048 }
  0x16   :  { %s39_s25 = sshll.u32 %s736_s24, 4  ;;  %p708_p8 = scmp.ne.s32.totalorder %s867_s3, %s707_s28  ;;  %s40_s25 = int_to_ptr.vmem [resolvable:$true] %s39_s25 }
  0x17   :  { %p711_p9 = scmp.lt.u32.totalorder %s707_s28, %s867_s3 }
  0x19   :  { %p713_p10 = pnand %p711_p9, %p708_p8 }
  0x1b   :  { %716 = shalt.err (!%p713_p10)
}
  0x1c   :  { %s717_s13 = scalar_lea.vmem %s40_s25, 2048  ;;  %p722_p12 = scmp.lt.s32.totalorder %s40_s25, %s40_s25 }
  0x1d   :  { %p718_p11 = scmp.ne.s32.totalorder %s40_s25, %s717_s13  ;;  %p723_p13 = scmp.lt.s32.totalorder %s717_s13, %s717_s13 }
  0x1f   :  { %p724_p0 = por %p723_p13, %p722_p12 }
  0x21   :  { %p725_p1 = pnand %p724_p0, %p718_p11 }
  0x23   :  { %728 = shalt.err (!%p725_p1)
}
  0x24   :  { %s737_s1 = smov 64   ;;  %s738_s12 = smov 4  }
  0x25   :  { %45 = dma.hbm_to_vmem [thread:$0]  %s867_s3, 2048, %s40_s25, [#allocation6], %s737_s1, %s737_s1, %s738_s12  }
  0x26   :  { %729 = dma.done.wait [#allocation4], 1664  }
  0x27   :  { %730 = vsyncadd [#allocation4], 4294965632 }
  0x28   :  { %731 = dma.done.wait [#allocation6], 2048  }
  0x29   :  { %732 = vsyncadd [#allocation6], 4294965248  ;;  %v739_v1 = vmov 0   ;;  %v637_v2 = vld [vmem:[#allocation3 + $0x4] ss:$8 sps:$4 sm:$0xff]   ;;  %v659_v14 = vld [vmem:[#allocation5 + $0x48] sm:$0xff]   ;;  %v80_v43 = vlaneseq }
  0x2a   :  { %198 = vmatprep.mubr.bf16.mxu0 %v739_v1  ;;  %v639_v3 = vld [vmem:[#allocation3] ss:$8 sps:$4 sm:$0xff]   ;;  %166 = vmatprep.subr.bf16.mxu0 %v637_v2  ;;  %v640_v4 = vld [vmem:[#allocation3 + $0x14] ss:$8 sps:$4 sm:$0xff]   ;;  %v642_v5 = vld [vmem:[#allocation3 + $0x10] ss:$8 sps:$4 sm:$0xff]  }
  0x2b   :  { %167 = vmatpush1.bf16.msra.mxu0 %v639_v3  ;;  %v643_v6 = vld [vmem:[#allocation3 + $0x24] ss:$8 sps:$4 sm:$0xff]   ;;  %v645_v7 = vld [vmem:[#allocation3 + $0x20] ss:$8 sps:$4 sm:$0xff]   ;;  %v646_v8 = vld [vmem:[#allocation3 + $0x34] ss:$8 sps:$4 sm:$0xff]  }
  0x2c   :  { %168 = vmatprep.subr.bf16.mxu0 %v640_v4  ;;  %v648_v9 = vld [vmem:[#allocation3 + $0x30] ss:$8 sps:$4 sm:$0xff]   ;;  %v657_v10 = vld [vmem:[#allocation5 + $0x40] sm:$0xff]   ;;  %v77_v13 = vld [vmem:[#allocation3 + $0x60] sm:$0xff]  ;;  %vm159_vm0 = vcmask 1043456   ;;  %vm155_vm1 = vcmask 850944  }
  0x2d   :  { %v649_v11 = vld [vmem:[#allocation3 + $0x44] ss:$8 sps:$4 sm:$0xff]   ;;  %577 = vmatprep.subr.bf16.mxu1 %v657_v10  ;;  %v660_v15 = vld [vmem:[#allocation5 + $0x8] sm:$0xff]   ;;  %v661_v16 = vld [vmem:[#allocation5 + $0x50] sm:$0xff]   ;;  %v545_v19 = vcombine.low %v77_v13, %v77_v13  ;;  %v546_v23 = vcombine.high %v77_v13, %v77_v13  ;;  %v740_v37 = vmov 0.0   ;;  %v81_v44 = vshrl.u32 %v80_v43, 7 }
  0x2e   :  { %v658_v12 = vld [vmem:[#allocation5] sm:$0xff]   ;;  %v652_v18 = vld [vmem:[#allocation3 + $0x54] ss:$8 sps:$4 sm:$0xff]   ;;  %v663_v21 = vld [vmem:[#allocation5 + $0x58] sm:$0xff]   ;;  %vm741_vm2 = vmmov 0   ;;  %vm508_vm3 = vcmask 261120  }
  0x2f   :  { %169 = vmatpush1.bf16.msra.mxu0 %v642_v5  ;;  %578 = vmatpush3.bf16.msra.mxu1 %v658_v12  ;;  %v651_v17 = vld [vmem:[#allocation3 + $0x40] ss:$8 sps:$4 sm:$0xff]   ;;  %v662_v20 = vld [vmem:[#allocation5 + $0x10] sm:$0xff]   ;;  %v161_v24 = vsel %vm159_vm0, %v545_v19, 0  ;;  %v667_v29 = vld [vmem:[#allocation5 + $0x68] sm:$0xff]   ;;  %v82_v45 = vsub.s32 0, %v81_v44 }
  0x30   :  { %170 = vmatprep.subr.bf16.mxu0 %v643_v6  ;;  %579 = vmatprep.subr.bf16.mxu1 %v659_v14  ;;  %v654_v22 = vld [vmem:[#allocation3 + $0x50] ss:$8 sps:$4 sm:$0xff]   ;;  %v664_v25 = vld [vmem:[#allocation5 + $0x18] sm:$0xff]   ;;  %v665_v26 = vld [vmem:[#allocation5 + $0x60] sm:$0xff]   ;;  %v86_v47 = vsub.s32 1, %v81_v44  ;;  %vm525_vm4 = vcmask 7168  }
  0x31   :  { %v63_v27 = vld [vmem:[%s864_s0] sm:$0xff]  ;;  %v666_v28 = vld [vmem:[#allocation5 + $0x20] sm:$0xff]   ;;  %v668_v31 = vld [vmem:[#allocation5 + $0x28] sm:$0xff]  }
  0x32   :  { %v64_v30 = vpack.c.bf16 %v63_v27, %v63_v27  ;;  %v669_v32 = vld [vmem:[#allocation5 + $0x70] sm:$0xff]   ;;  %v671_v34 = vld [vmem:[#allocation5 + $0x78] sm:$0xff]   ;;  %v675_v39 = vld [vmem:[%s869_s5 + $0x10] sm:$0xff]  }
  0x33   :  { %171 = vmatpush1.bf16.msra.mxu0 %v645_v7  ;;  %580 = vmatpush3.bf16.msra.mxu1 %v660_v15  ;;  %v670_v33 = vld [vmem:[#allocation5 + $0x30] sm:$0xff]   ;;  %v672_v35 = vld [vmem:[#allocation5 + $0x38] sm:$0xff]   ;;  %v679_v60 = vld [vmem:[%s869_s5 + $0x30] sm:$0xff]  }
  0x34   :  { %172 = vmatprep.subr.bf16.mxu0 %v646_v8  ;;  %581 = vmatprep.subr.bf16.mxu1 %v661_v16  ;;  %v673_v36 = vld [vmem:[%s869_s5] sm:$0xff]   ;;  %v674_v38 = vld [vmem:[%s869_s5 + $0x8] sm:$0xff]   ;;  %v676_v40 = vld [vmem:[%s869_s5 + $0x18] sm:$0xff]  }
  0x35   :  { %v677_v41 = vld [vmem:[%s869_s5 + $0x20] sm:$0xff]   ;;  %v678_v42 = vld [vmem:[%s869_s5 + $0x28] sm:$0xff]   ;;  %v680_v61 = vld [vmem:[%s869_s5 + $0x38] sm:$0xff]  }
  0x36   :  { %v78_v46 = vld [vmem:[%s866_s2] sm:$0x3] }
  0x37   :  { %173 = vmatpush1.bf16.msra.mxu0 %v648_v9  ;;  %582 = vmatpush3.bf16.msra.mxu1 %v662_v20  ;;  %v83_v48 = vrot.slane %v78_v46, %v82_v45  ;;  %v87_v49 = vrot.slane %v78_v46, %v86_v47  ;;  %v549_v63 = vld [vmem:[%s868_s4] ss:$0 sm:$0xff] }
  0x38   :  { %174 = vmatprep.subr.bf16.mxu0 %v649_v11  ;;  %583 = vmatprep.subr.bf16.mxu1 %v663_v21  ;;  %v566_v7 = vld [vmem:[%s870_s6] ss:$0 sm:$0xff] }
  0x39   :  { %v575_v12 = vld [vmem:[%s871_s7] ss:$0 sm:$0xff] }
  0x3b   :  { %175 = vmatpush1.bf16.msra.mxu0 %v651_v17  ;;  %584 = vmatpush3.bf16.msra.mxu1 %v664_v25  ;;  %v576_v17 = vld [vmem:[#allocation2] ss:$0 sm:$0xff] }
  0x3c   :  { %176 = vmatprep.subr.bf16.mxu0 %v652_v18  ;;  %585 = vmatprep.subr.bf16.mxu1 %v665_v26 }
  0x3f   :  { %177 = vmatpush1.bf16.msra.mxu0 %v654_v22  ;;  %586 = vmatpush3.bf16.msra.mxu1 %v666_v28 }
  0x40   :  { %547 = vmatprep.subr.msk.bf16.mxu0 %vm159_vm0, %v546_v23  ;;  %587 = vmatprep.subr.bf16.mxu1 %v667_v29 }
  0x43   :  { %179 = vmatpush1.bf16.msra.mxu0 %v161_v24  ;;  %588 = vmatpush3.bf16.msra.mxu1 %v668_v31 }
  0x44   :  { %589 = vmatprep.subr.bf16.mxu1 %v669_v32  ;;  %608 = vmatprep.subr.bf16.mxu0 %v740_v37 }
  0x46   :  { %548 = vmatmul.mubr.msk.bf16.vlgmr.msra.gmra.mrb[0].mxu0 %vm155_vm1, %v64_v30 }
  0x47   :  { %590 = vmatpush3.bf16.msra.mxu1 %v670_v33  ;;  %609 = vmatpush3.bf16.msra.mxu0 %v673_v36 }
  0x48   :  { %591 = vmatprep.subr.bf16.mxu1 %v671_v34  ;;  %610 = vmatprep.subr.bf16.mxu0 %v740_v37 }
  0x49   :  { %624 = vmatprep.mubr.msk.bf16.mxu0 %vm741_vm2, %v740_v37 }
  0x4b   :  { %592 = vmatpush3.bf16.msra.mxu1 %v672_v35  ;;  %611 = vmatpush3.bf16.msra.mxu0 %v674_v38 }
  0x4c   :  { %612 = vmatprep.subr.bf16.mxu0 %v740_v37 }
  0x4f   :  { %613 = vmatpush3.bf16.msra.mxu0 %v675_v39 }
  0x50   :  { %614 = vmatprep.subr.bf16.mxu0 %v740_v37 }
  0x53   :  { %615 = vmatpush3.bf16.msra.mxu0 %v676_v40 }
  0x54   :  { %616 = vmatprep.subr.bf16.mxu0 %v740_v37 }
  0x57   :  { %617 = vmatpush3.bf16.msra.mxu0 %v677_v41 }
  0x58   :  { %618 = vmatprep.subr.bf16.mxu0 %v740_v37 }
  0x5b   :  { %619 = vmatpush3.bf16.msra.mxu0 %v678_v42 }
  0x5c   :  { %620 = vmatprep.subr.bf16.mxu0 %v740_v37 }
  0x5f   :  { %621 = vmatpush3.bf16.msra.mxu0 %v679_v60 }
  0x60   :  { %622 = vmatprep.subr.bf16.mxu0 %v740_v37 }
  0x63   :  { %623 = vmatpush3.bf16.msra.mxu0 %v680_v61 }
 0x119   :  { %v200_v50 = vpop.f32.mrb[0].mxu0 }
 0x11a   :  { %v201_v51 = vadd.f32 %v200_v50, %v83_v48  ;;  %v202_v52 = vpop.f32.mrb[1].mxu0 }
 0x11b   :  { %v203_v53 = vadd.f32 %v202_v52, %v87_v49  ;;  %v204_v54 = vpop.f32.mrb[2].mxu0 }
 0x11c   :  { %v207_v55 = vmax.f32 %v201_v51, 0.0  ;;  %v205_v56 = vpop.f32.mrb[3].mxu0 }
 0x11d   :  { %v208_v57 = vmax.f32 %v203_v53, 0.0 }
 0x11e   :  { %v209_v59 = vpack.c.bf16 %v207_v55, %v207_v55 }
 0x11f   :  { %v210_v58 = vpack.c.bf16 %v208_v57, %v208_v57 }
 0x121   :  { %378 = vmatprep.mubr.bf16.mxu1 %v210_v58 }
 0x122   :  { %379 = vmatmul.mubr.bf16.vlgmr.msra.gmra.mrb[0].mxu1 %v209_v59 }
 0x1f5   :  { %v593_v62 = vpop.f32.mrb[0].mxu1 }
 0x1f6   :  { %v594_v0 = vpop.f32.mrb[1].mxu1 }
 0x1f7   :  { %v595_v1 = vadd.f32 %v594_v0, %v593_v62  ;;  %v596_v2 = vpop.f32.mrb[2].mxu1 }
 0x1f8   :  { %v597_v3 = vpop.f32.mrb[3].mxu1 }
 0x1f9   :  { %v381_v4 = vadd.f32 %v595_v1, %v549_v63 }
 0x1fb   :  { %v386_v5 = vmax.f32 %v381_v4, 0.0 }
 0x1fd   :  { %v387_v6 = vpack.c.bf16 %v386_v5, %v386_v5 }
 0x1ff   :  { %625 = vmatmul.mubr.bf16.vlgmr.msra.gmra.mrb[4].mxu0 %v387_v6 }
 0x2d2   :  { %v493_v8 = vpop.f32.mrb[4].mxu0 }
 0x2d3   :  { %v494_v9 = vadd.f32 %v566_v7, %v493_v8  ;;  %v626_v10 = vpop.f32.mrb[5].mxu0 }
 0x2d4   :  { %v496_v11 = vpop.f32.mrb[6].mxu0 }
 0x2d5   :  { %v499_v13 = vmax.f32 %v494_v9, 0.0  ;;  %v627_v14 = vpop.f32.mrb[7].mxu0 }
 0x2d7   :  { %v507_v15 = vmul.f32 %v575_v12, %v499_v13 }
 0x2d9   :  { %v509_v16 = vsel %vm508_vm3, %v507_v15, 0.0 }
 0x2da   :  { %510 = vadd.xlane.f32.xlu0 %v509_v16 }
 0x367   :  { %v511_v18 = vpop.xlane.xlu0 %510 }
 0x368   :  { %v519_v19 = vadd.f32 %v576_v17, %v511_v18 }
 0x36a   :  { %v520_v20 = vsub.f32 0.0, %v519_v19 }
 0x36c   :  { %v521_v21 = vmul.f32 1.442695, %v520_v20 }
 0x36e   :  { %681 = vpow2.f32 %v521_v21 }
 0x378   :  { %v682_v22 = vpop.eup %681 }
 0x379   :  { %v523_v23 = vadd.f32 1.0, %v682_v22 }
 0x37b   :  { %683 = vrcp.f32 %v523_v23 }
 0x385   :  { %v684_v24 = vpop.eup %683 }
 0x386   :  { %526 = vst.msk [vmem:[%s873_s9] sm:$0xff] %vm525_vm4, %v684_v24 }
 0x387   :  { %531 = vsyncpa [#allocation4], 1 }
 0x388   :  { %532 = vsyncpa [#allocation6], 1 }

</bundles_post_ra>
